<compile_context>
chip_gen: v7x
topology: tpu7x:2x2x1
jax: 0.10.0
libtpu: 0.0.40
codegen_flags: <defaults>
</compile_context>

<pallas_src>
import functools

import numpy as np
import jax
import jax.numpy as jnp
from jax.experimental import pallas as pl
from jax.experimental.pallas import tpu as pltpu


# --------------------------------------------------------------------------
# Small helpers
# --------------------------------------------------------------------------
def _round_up(v, m):
    return ((v + m - 1) // m) * m


def _pad2(arr, rows, cols):
    out = jnp.zeros((rows, cols), arr.dtype)
    return out.at[:arr.shape[0], :arr.shape[1]].set(arr)


def _vmem_limit(need_bytes):
    # Explicit scoped-VMEM limit: v5e default is only 16 MiB; cap at 64 MiB so
    # the setting is also valid on v7x (64 MiB physical VMEM).
    return int(min(64 * 1024 * 1024, max(32 * 1024 * 1024, 2 * need_bytes)))


def _choose_tiles(n, tm, tk):
    if tm <= 0 or tk <= 0 or tm % 128 or tk % 128:
        raise ValueError("tm and tk must be positive multiples of 128")
    n128 = _round_up(n, 128)
    tk = min(tk, n128)
    tm = min(tm, tk)
    while tk % tm:          # make tm divide tk so one n_pad serves both
        tm -= 128
    n_pad = _round_up(n, tk)
    return tm, tk, n_pad


# --------------------------------------------------------------------------
# Kernel 1: XW = X @ W  (computed ONCE per layer, bf16 output)
# --------------------------------------------------------------------------
def _xw_kernel(x_ref, w_ref, o_ref):
    o_ref[...] = jnp.dot(x_ref[...], w_ref[...],
                         preferred_element_type=jnp.float32).astype(o_ref.dtype)


def _xw_matmul(x_p, w_p, *, tm):
    n_pad, f_pad = x_p.shape
    _, o_pad = w_p.shape
    grid = (n_pad // tm,)

    need = (2 * tm * f_pad * 2          # X tiles (double-buffered, bf16)
            + f_pad * o_pad * 2         # W resident
            + 2 * tm * o_pad * 2)       # out tiles

    return pl.pallas_call(
        _xw_kernel,
        out_shape=jax.ShapeDtypeStruct((n_pad, o_pad), jnp.bfloat16),
        grid_spec=pltpu.PrefetchScalarGridSpec(
            num_scalar_prefetch=0,
            grid=grid,
            in_specs=[
                pl.BlockSpec((tm, f_pad), lambda i: (i, 0)),    # X row tile
                pl.BlockSpec((f_pad, o_pad), lambda i: (0, 0)),  # W (resident)
            ],
            out_specs=pl.BlockSpec((tm, o_pad), lambda i: (i, 0)),
        ),
        compiler_params=pltpu.CompilerParams(
            dimension_semantics=("parallel",),
            vmem_limit_bytes=_vmem_limit(need)),
        cost_estimate=pl.CostEstimate(
            flops=2 * n_pad * f_pad * o_pad,
            transcendentals=0,
            bytes_accessed=(x_p.size * 2 + w_p.size * 2 * grid[0]
                            + n_pad * o_pad * 2)),
    )(x_p, w_p)


# --------------------------------------------------------------------------
# Kernel 2: sparse-tile aggregation  out = act( A_hat @ XW + b )
#   Grid is a compacted 1-D list of nonzero A tiles; scalar-prefetched SMEM
#   arrays give (row_tile, col_tile, first_in_row, last_in_row) per step.
# --------------------------------------------------------------------------
def _gcn_aggregate_kernel(rt_ref, ct_ref, first_ref, last_ref,
                          a_ref, xw_ref, b_ref, o_ref, acc_ref,
                          *, activation, num_valid_cols):
    s = pl.program_id(0)

    @pl.when(first_ref[s] == 1)
    def _init():
        acc_ref[...] = jnp.zeros_like(acc_ref)

    acc_ref[...] += jnp.dot(a_ref[...], xw_ref[...],
                            preferred_element_type=jnp.float32)

    @pl.when(last_ref[s] == 1)
    def _finalize():
        z = acc_ref[...] + b_ref[...]            # bias added once per row tile
        if activation == "relu":
            o_ref[...] = jnp.maximum(z, 0.0).astype(o_ref.dtype)
        else:  # masked, numerically-stable log_softmax over padded class axis
            col = jax.lax.broadcasted_iota(jnp.int32, z.shape, 1)
            z = jnp.where(col < num_valid_cols, z, -1e30)
            m = jnp.max(z, axis=1, keepdims=True)
            e = z - m
            lse = jnp.log(jnp.sum(jnp.exp(e), axis=1, keepdims=True))
            o_ref[...] = (e - lse).astype(o_ref.dtype)


def _gcn_aggregate(a_p, xw, b_p, schedule, *, out_dtype, activation,
                   num_valid_cols, tm, tk):
    rt, ct, first, last = schedule
    n_pad = a_p.shape[0]
    o_pad = xw.shape[1]
    nsteps = int(rt.shape[0])
    out_itemsize = jnp.dtype(out_dtype).itemsize

    kernel = functools.partial(_gcn_aggregate_kernel,
                               activation=activation,
                               num_valid_cols=num_valid_cols)

    need = (2 * tm * tk * 2            # A tiles (double-buffered, bf16)
            + 2 * tk * o_pad * 2       # XW tiles
            + 2 * o_pad * 4            # bias
            + 2 * tm * o_pad * out_itemsize   # out tiles
            + tm * o_pad * 4)          # f32 accumulator

    flops = 2 * nsteps * tm * tk * o_pad
    bytes_accessed = (nsteps * (tm * tk * 2 + tk * o_pad * 2)
                      + n_pad * o_pad * out_itemsize)
    transcendentals = n_pad * o_pad if activation == "log_softmax" else 0

    return pl.pallas_call(
        kernel,
        out_shape=jax.ShapeDtypeStruct((n_pad, o_pad), out_dtype),
        grid_spec=pltpu.PrefetchScalarGridSpec(
            num_scalar_prefetch=4,            # rt, ct, first, last -> SMEM
            grid=(nsteps,),
            in_specs=[
                # A_hat: data-dependent (row_tile, col_tile) of this step.
                pl.BlockSpec((tm, tk),
                             lambda s, rt, ct, fst, lst: (rt[s], ct[s])),
                # XW: K-tile matching the A column tile.
                pl.BlockSpec((tk, o_pad),
                             lambda s, rt, ct, fst, lst: (ct[s], 0)),
                # bias (resident).
                pl.BlockSpec((1, o_pad),
                             lambda s, rt, ct, fst, lst: (0, 0)),
            ],
            out_specs=pl.BlockSpec((tm, o_pad),
                                   lambda s, rt, ct, fst, lst: (rt[s], 0)),
            scratch_shapes=[pltpu.VMEM((tm, o_pad), jnp.float32)],
        ),
        compiler_params=pltpu.CompilerParams(
            dimension_semantics=("arbitrary",),
            vmem_limit_bytes=_vmem_limit(need)),
        cost_estimate=pl.CostEstimate(flops=flops,
                                      transcendentals=transcendentals,
                                      bytes_accessed=bytes_accessed),
    )(rt, ct, first, last, a_p, xw, b_p)


# --------------------------------------------------------------------------
# Sparse tile schedule (host-side, on the concrete padded A_hat)
# --------------------------------------------------------------------------
def _sparse_tile_schedule(a_p, tm, tk):
    n_pad = a_p.shape[0]
    nrt, nkt = n_pad // tm, n_pad // tk
    occ = np.asarray(
        jnp.any(jnp.reshape(a_p != 0, (nrt, tm, nkt, tk)), axis=(1, 3)))
    rows, cols = np.nonzero(occ)   # row-major: rows sorted, groups contiguous

    # Defensive: every output row tile must be visited at least once (with
    # self loops the diagonal tile is always nonzero, so this rarely fires).
    missing = np.setdiff1d(np.arange(nrt), rows)
    if missing.size:
        rows = np.concatenate([rows, missing])
        cols = np.concatenate([cols, np.zeros_like(missing)])
        order = np.argsort(rows, kind="stable")
        rows, cols = rows[order], cols[order]

    first = np.ones(rows.shape, np.int32)
    first[1:] = (rows[1:] != rows[:-1]).astype(np.int32)
    last = np.ones(rows.shape, np.int32)
    last[:-1] = (rows[1:] != rows[:-1]).astype(np.int32)

    dev = lambda v: jnp.asarray(np.asarray(v, np.int32))
    return dev(rows), dev(cols), dev(first), dev(last)


# --------------------------------------------------------------------------
# Wrapper: padding / dtype plumbing + two layer calls
# --------------------------------------------------------------------------
def gcn_forward(a_hat, x, w1, b1, w2, b2, *, tm=512, tk=1024):
    n = x.shape[0]
    f, h = w1.shape
    _, c = w2.shape

    tm, tk, n_pad = _choose_tiles(n, tm, tk)
    f_pad = _round_up(f, 128)
    h_pad = _round_up(h, 128)
    c_pad = _round_up(c, 128)

    a_p = _pad2(jnp.asarray(a_hat, jnp.float32).astype(jnp.bfloat16),
                n_pad, n_pad)
    x_p = _pad2(jnp.asarray(x).astype(jnp.bfloat16), n_pad, f_pad)
    w1_p = _pad2(jnp.asarray(w1).astype(jnp.bfloat16), f_pad, h_pad)
    b1_p = _pad2(jnp.reshape(b1, (1, -1)).astype(jnp.float32), 1, h_pad)
    w2_p = _pad2(jnp.asarray(w2).astype(jnp.bfloat16), h_pad, c_pad)
    b2_p = _pad2(jnp.reshape(b2, (1, -1)).astype(jnp.float32), 1, c_pad)

    # Compacted nonzero-tile schedule of A_hat (shared by both layers).
    schedule = _sparse_tile_schedule(a_p, tm, tk)

    # Layer 1: XW hoisted once, then sparse aggregation + ReLU (bf16 out).
    xw1 = _xw_matmul(x_p, w1_p, tm=tm)
    h_out = _gcn_aggregate(a_p, xw1, b1_p, schedule,
                           out_dtype=jnp.bfloat16, activation="relu",
                           num_valid_cols=h_pad, tm=tm, tk=tk)

    # Layer 2: same structure, masked log_softmax over padded class axis.
    xw2 = _xw_matmul(h_out, w2_p, tm=tm)
    z = _gcn_aggregate(a_p, xw2, b2_p, schedule,
                       out_dtype=jnp.float32, activation="log_softmax",
                       num_valid_cols=c, tm=tm, tk=tk)

    return z[:n, :c]


# --------------------------------------------------------------------------
# Plain-JAX glue: adjacency normalization + parameter init + reference
# --------------------------------------------------------------------------
def normalized_adjacency(edge_index, num_nodes):
    """Dense D^-1/2 (A + I) D^-1/2, undirected simple graph (nx.Graph style)."""
    src, dst = edge_index
    a = jnp.zeros((num_nodes, num_nodes), jnp.float32)
    a = a.at[src, dst].set(1.0)
    a = a.at[dst, src].set(1.0)                                   # undirected
    a = jnp.maximum(a, jnp.eye(num_nodes, dtype=jnp.float32))     # self loops
    deg = a.sum(axis=1)
    d_inv_sqrt = jnp.where(deg > 0, 1.0 / jnp.sqrt(deg), 0.0)
    return a * d_inv_sqrt[:, None] * d_inv_sqrt[None, :]


def glorot(key, shape):
    fan_in, fan_out = shape
    scale = jnp.sqrt(2.0 / (fan_in + fan_out))
    return jax.random.normal(key, shape, dtype=jnp.float32) * scale


def gcn_reference(a_hat, x, w1, b1, w2, b2):
    h = jnp.maximum(a_hat @ (x @ w1) + b1, 0.0)
    z = a_hat @ (h @ w2) + b2
    return jax.nn.log_softmax(z, axis=1)


# TODO(synk): the original module's Neo4j / pandas / networkx graph ingestion
# has no Pallas equivalent; a synthetic edge_index stands in for it here.
if __name__ == "__main__":
    N, INPUT_DIM, HIDDEN_DIM, OUTPUT_DIM = 16, 8, 32, 4
    NUM_EDGES = 24

    key = jax.random.PRNGKey(0)
    k_src, k_dst, k_x, k_w1, k_b1, k_w2, k_b2 = jax.random.split(key, 7)

    src = jax.random.randint(k_src, (NUM_EDGES,), 0, N)
    dst = jax.random.randint(k_dst, (NUM_EDGES,), 0, N)
    edge_index = jnp.stack([src, dst], axis=0)

    x = jax.random.normal(k_x, (N, INPUT_DIM), dtype=jnp.float32)
    w1 = glorot(k_w1, (INPUT_DIM, HIDDEN_DIM))
    b1 = jax.random.normal(k_b1, (1, HIDDEN_DIM), dtype=jnp.float32) * 0.01
    w2 = glorot(k_w2, (HIDDEN_DIM, OUTPUT_DIM))
    b2 = jax.random.normal(k_b2, (1, OUTPUT_DIM), dtype=jnp.float32) * 0.01

    a_hat = normalized_adjacency(edge_index, N)

    out = gcn_forward(a_hat, x, w1, b1, w2, b2)
    out = jax.block_until_ready(out)

    assert out.shape == (N, OUTPUT_DIM)
    # log_softmax rows sum (in prob space) to ~1.
    assert jnp.allclose(jnp.exp(out).sum(axis=1), 1.0, atol=1e-4)
    # Matches the f32 reference up to bf16 input-cast noise.
    ref = gcn_reference(a_hat, x, w1, b1, w2, b2)
    assert jnp.allclose(out, ref, atol=5e-2), float(jnp.abs(out - ref).max())

    print("KERNEL_OK")
</pallas_src>

<mosaic_0001>
module attributes {stable_mosaic.version = 11 : i64} {
  func.func @_xw_kernel(%arg0: i32, %arg1: memref<128x128xbf16, #tpu.memory_space<vmem>>, %arg2: memref<128x128xbf16, #tpu.memory_space<vmem>>, %arg3: memref<128x128xbf16, #tpu.memory_space<vmem>>) attributes {dimension_semantics = [#tpu.dimension_semantics<parallel>], iteration_bounds = array<i64: 1>, scalar_prefetch = 0 : i64, scratch_operands = 0 : i64, tpu.core_type = #tpu.core_type<tc>, window_params = [{transform_indices = @transform_0, window_bounds = array<i64: 128, 128>}, {pipeline_mode = #tpu.pipeline_mode<synchronous>, transform_indices = @transform_1, window_bounds = array<i64: 128, 128>}, {transform_indices = @transform_2, window_bounds = array<i64: 128, 128>}]} {
    %c0 = arith.constant 0 : index
    %c0_0 = arith.constant 0 : index
    %0 = vector.load %arg1[%c0, %c0_0] : memref<128x128xbf16, #tpu.memory_space<vmem>>, vector<128x128xbf16>
    %c0_1 = arith.constant 0 : index
    %c0_2 = arith.constant 0 : index
    %1 = vector.load %arg2[%c0_1, %c0_2] : memref<128x128xbf16, #tpu.memory_space<vmem>>, vector<128x128xbf16>
    %cst = arith.constant dense<0.000000e+00> : vector<128x128xf32>
    %2 = tpu.matmul %0, %1, %cst {dimension_numbers = #tpu.dot_dimension_numbers<[1], [0], [0], [1], [0, 0, 1, 1], [], []>} : vector<128x128xbf16>, vector<128x128xbf16>, vector<128x128xf32> -> vector<128x128xf32>
    %3 = arith.truncf %2 : vector<128x128xf32> to vector<128x128xbf16>
    %c0_3 = arith.constant 0 : index
    %c0_4 = arith.constant 0 : index
    %4 = vector.load %arg3[%c0_3, %c0_4] : memref<128x128xbf16, #tpu.memory_space<vmem>>, vector<128x128xbf16>
    tpu.vector_store %arg3[%c0_3, %c0_4], %3 {strides = array<i32>} : memref<128x128xbf16, #tpu.memory_space<vmem>>, vector<128x128xbf16>,
    return
  }
  func.func @transform_0(%arg0: i32) -> (i32, i32) {
    %c0_i32 = arith.constant 0 : i32
    %c0_i32_0 = arith.constant 0 : i32
    return %arg0, %c0_i32 : i32, i32
  }
  func.func @transform_1(%arg0: i32) -> (i32, i32) {
    %c0_i32 = arith.constant 0 : i32
    %c0_i32_0 = arith.constant 0 : i32
    %c0_i32_1 = arith.constant 0 : i32
    return %c0_i32, %c0_i32_0 : i32, i32
  }
  func.func @transform_2(%arg0: i32) -> (i32, i32) {
    %c0_i32 = arith.constant 0 : i32
    %c0_i32_0 = arith.constant 0 : i32
    return %arg0, %c0_i32 : i32, i32
  }
}

</mosaic_0001>

<bundles_post_ra>
// kernel: tpu_custom_call.1
= control target key start
LH: loop header
LB: loop body
LE: loop exit
PB: predicated region body
PF: predicated region fallthrough
CT: control target
= control target key end

     0   :  { %7 = vsyncpa [#allocation3], 0  ;;  %s681_s0 = inlined_call_operand.hbm [shape: bf16[128,128], index: 0, kind: input, shape index: {}]   ;;  %s682_s1 = inlined_call_operand.hbm [shape: bf16[128,128], index: 1, kind: input, shape index: {}]   ;;  %s683_s2 = inlined_call_operand.hbm [shape: bf16[128,128], index: 2, kind: output, shape index: {}]  }
   0x1   :  { %8 = vsyncpa [#allocation6], 0 }
   0x2   :  { %9 = vsyncpa [#allocation4], 0  ;;  %s616_s9 = smov [#allocation2]   ;;  %s544_s13 = scalar_lea.hbm %s681_s0, 1024 }
   0x3   :  { %s15_s10 = sshll.u32 %s616_s9, 4  ;;  %p545_p0 = scmp.ne.s32.totalorder %s681_s0, %s544_s13  ;;  %s16_s10 = int_to_ptr.vmem [resolvable:$true] %s15_s10 }
   0x4   :  { %p548_p1 = scmp.lt.u32.totalorder %s544_s13, %s681_s0 }
   0x6   :  { %p550_p2 = pnand %p548_p1, %p545_p0 }
   0x8   :  { %553 = shalt.err (!%p550_p2)
}
   0x9   :  { %s554_s18 = scalar_lea.vmem %s16_s10, 1024  ;;  %p559_p4 = scmp.lt.s32.totalorder %s16_s10, %s16_s10 }
   0xa   :  { %p555_p3 = scmp.ne.s32.totalorder %s16_s10, %s554_s18  ;;  %p560_p5 = scmp.lt.s32.totalorder %s554_s18, %s554_s18 }
   0xc   :  { %p561_p6 = por %p560_p5, %p559_p4 }
   0xe   :  { %p562_p7 = pnand %p561_p6, %p555_p3 }
  0x10   :  { %565 = shalt.err (!%p562_p7)
}
  0x11   :  { %s617_s19 = smov 64   ;;  %s618_s20 = smov 4  }
  0x12   :  { %21 = dma.hbm_to_vmem [thread:$0]  %s681_s0, 1024, %s16_s10, [#allocation3], %s617_s19, %s617_s19, %s618_s20  }
  0x13   :  { %s619_s23 = smov [#allocation5]   ;;  %s566_s27 = scalar_lea.hbm %s682_s1, 1024 }
  0x14   :  { %s27_s24 = sshll.u32 %s619_s23, 4  ;;  %p567_p8 = scmp.ne.s32.totalorder %s682_s1, %s566_s27  ;;  %s28_s24 = int_to_ptr.vmem [resolvable:$true] %s27_s24 }
  0x15   :  { %p570_p9 = scmp.lt.u32.totalorder %s566_s27, %s682_s1 }
  0x17   :  { %p572_p10 = pnand %p570_p9, %p567_p8 }
  0x19   :  { %575 = shalt.err (!%p572_p10)
}
  0x1a   :  { %s576_s4 = scalar_lea.vmem %s28_s24, 1024  ;;  %p581_p12 = scmp.lt.s32.totalorder %s28_s24, %s28_s24 }
  0x1b   :  { %p577_p11 = scmp.ne.s32.totalorder %s28_s24, %s576_s4  ;;  %p582_p13 = scmp.lt.s32.totalorder %s576_s4, %s576_s4 }
  0x1d   :  { %p583_p0 = por %p582_p13, %p581_p12 }
  0x1f   :  { %p584_p1 = pnand %p583_p0, %p577_p11 }
  0x21   :  { %587 = shalt.err (!%p584_p1)
}
  0x22   :  { %33 = dma.hbm_to_vmem [thread:$0]  %s682_s1, 1024, %s28_s24, [#allocation6], %s617_s19, %s617_s19, %s618_s20  }
  0x23   :  { %610 = dma.done.wait [#allocation3], 1024  }
  0x24   :  { %611 = vsyncadd [#allocation3], 4294966272 }
  0x25   :  { %612 = dma.done.wait [#allocation6], 1024  }
  0x26   :  { %613 = vsyncadd [#allocation6], 4294966272  ;;  %v528_v0 = vld [vmem:[#allocation5] sm:$0xff]   ;;  %v529_v1 = vld [vmem:[#allocation5 + $0x8] sm:$0xff]   ;;  %s620_s1 = smov [#allocation7]  }
  0x27   :  { %475 = vmatprep.subr.bf16.mxu0 %v528_v0  ;;  %507 = vmatprep.subr.bf16.mxu1 %v528_v0  ;;  %v530_v2 = vld [vmem:[#allocation5 + $0x10] sm:$0xff]   ;;  %v531_v3 = vld [vmem:[#allocation5 + $0x18] sm:$0xff]   ;;  %v536_v4 = vld [vmem:[#allocation2] sm:$0xff]   ;;  %s351_s6 = sshll.u32 %s620_s1, 4  ;;  %s352_s6 = int_to_ptr.vmem [resolvable:$true] %s351_s6 }
  0x28   :  { %476 = vmatpush3.bf16.msra.mxu0 %v528_v0  ;;  %515 = vmatpush3.bf16.msra.mxu1 %v528_v0  ;;  %v537_v5 = vld [vmem:[#allocation2 + $0x20] sm:$0xff]   ;;  %v533_v7 = vld [vmem:[#allocation5 + $0x28] sm:$0xff]   ;;  %v534_v8 = vld [vmem:[#allocation5 + $0x30] sm:$0xff]   ;;  %s588_s7 = scalar_lea.vmem %s352_s6, 1024  ;;  %p593_p3 = scmp.lt.s32.totalorder %s352_s6, %s352_s6 }
  0x29   :  { %477 = vmatprep.subr.bf16.mxu0 %v529_v1  ;;  %508 = vmatprep.subr.bf16.mxu1 %v529_v1  ;;  %v532_v6 = vld [vmem:[#allocation5 + $0x20] sm:$0xff]   ;;  %v535_v9 = vld [vmem:[#allocation5 + $0x38] sm:$0xff]   ;;  %v538_v10 = vld [vmem:[#allocation2 + $0x8] sm:$0xff]   ;;  %p589_p2 = scmp.ne.s32.totalorder %s352_s6, %s588_s7  ;;  %p594_p4 = scmp.lt.s32.totalorder %s588_s7, %s588_s7 }
  0x2a   :  { %491 = vmatprep.mubr.bf16.mxu0 %v536_v4  ;;  %499 = vmatprep.mubr.bf16.mxu1 %v537_v5  ;;  %v539_v11 = vld [vmem:[#allocation2 + $0x28] sm:$0xff]   ;;  %v540_v12 = vld [vmem:[#allocation2 + $0x10] sm:$0xff]   ;;  %v542_v14 = vld [vmem:[#allocation2 + $0x18] sm:$0xff]  }
  0x2b   :  { %v541_v13 = vld [vmem:[#allocation2 + $0x30] sm:$0xff]   ;;  %v543_v15 = vld [vmem:[#allocation2 + $0x38] sm:$0xff]   ;;  %p595_p5 = por %p594_p4, %p593_p3 }
  0x2c   :  { %478 = vmatpush3.bf16.msra.mxu0 %v529_v1  ;;  %516 = vmatpush3.bf16.msra.mxu1 %v529_v1 }
  0x2d   :  { %479 = vmatprep.subr.bf16.mxu0 %v530_v2  ;;  %509 = vmatprep.subr.bf16.mxu1 %v530_v2  ;;  %p596_p6 = pnand %p595_p5, %p589_p2 }
  0x30   :  { %480 = vmatpush3.bf16.msra.mxu0 %v530_v2  ;;  %517 = vmatpush3.bf16.msra.mxu1 %v530_v2 }
  0x31   :  { %481 = vmatprep.subr.bf16.mxu0 %v531_v3  ;;  %510 = vmatprep.subr.bf16.mxu1 %v531_v3 }
  0x34   :  { %482 = vmatpush3.bf16.msra.mxu0 %v531_v3  ;;  %518 = vmatpush3.bf16.msra.mxu1 %v531_v3 }
  0x35   :  { %483 = vmatprep.subr.bf16.mxu0 %v532_v6  ;;  %511 = vmatprep.subr.bf16.mxu1 %v532_v6 }
  0x38   :  { %484 = vmatpush3.bf16.msra.mxu0 %v532_v6  ;;  %519 = vmatpush3.bf16.msra.mxu1 %v532_v6 }
  0x39   :  { %485 = vmatprep.subr.bf16.mxu0 %v533_v7  ;;  %512 = vmatprep.subr.bf16.mxu1 %v533_v7 }
  0x3c   :  { %486 = vmatpush3.bf16.msra.mxu0 %v533_v7  ;;  %520 = vmatpush3.bf16.msra.mxu1 %v533_v7 }
  0x3d   :  { %487 = vmatprep.subr.bf16.mxu0 %v534_v8  ;;  %513 = vmatprep.subr.bf16.mxu1 %v534_v8 }
  0x40   :  { %488 = vmatpush3.bf16.msra.mxu0 %v534_v8  ;;  %521 = vmatpush3.bf16.msra.mxu1 %v534_v8 }
  0x41   :  { %489 = vmatprep.subr.bf16.mxu0 %v535_v9  ;;  %514 = vmatprep.subr.bf16.mxu1 %v535_v9 }
  0x44   :  { %490 = vmatpush3.bf16.msra.mxu0 %v535_v9  ;;  %522 = vmatpush3.bf16.msra.mxu1 %v535_v9 }
  0x47   :  { %492 = vmatmul.mubr.bf16.vlgmr.msra.gmra.mrb[0].mxu0 %v538_v10  ;;  %500 = vmatmul.mubr.bf16.vlgmr.msra.gmra.mrb[0].mxu1 %v539_v11 }
  0x48   :  { %495 = vmatprep.mubr.bf16.mxu0 %v540_v12  ;;  %503 = vmatprep.mubr.bf16.mxu1 %v541_v13 }
  0x4f   :  { %496 = vmatmul.mubr.bf16.gmra.mrb[4].mxu0 %v542_v14  ;;  %504 = vmatmul.mubr.bf16.gmra.mrb[4].mxu1 %v543_v15 }
 0x11a   :  { %v493_v16 = vpop.f32.mrb[0].mxu0  ;;  %v501_v17 = vpop.f32.mrb[0].mxu1 }
 0x11b   :  { %v203_v18 = vpop.f32.mrb[1].mxu0  ;;  %v235_v19 = vpop.f32.mrb[1].mxu1 }
 0x11c   :  { %v494_v20 = vpop.f32.mrb[2].mxu0  ;;  %v502_v21 = vpop.f32.mrb[2].mxu1 }
 0x11d   :  { %v420_v22 = vpack.c.bf16 %v494_v20, %v493_v16  ;;  %v440_v23 = vpack.c.bf16 %v502_v21, %v501_v17  ;;  %v206_v24 = vpop.f32.mrb[3].mxu0  ;;  %v238_v25 = vpop.f32.mrb[3].mxu1 }
 0x11e   :  { %v415_v26 = vpack.c.bf16 %v206_v24, %v203_v18  ;;  %v435_v27 = vpack.c.bf16 %v238_v25, %v235_v19 }
 0x11f   :  { %452 = vst [vmem:[#allocation7 + $0x8] sm:$0xff] %v420_v22   ;;  %456 = vst [vmem:[#allocation7 + $0x28] sm:$0xff] %v440_v23  }
 0x120   :  { %416 = vst [vmem:[#allocation7] sm:$0xff] %v415_v26   ;;  %455 = vst [vmem:[#allocation7 + $0x20] sm:$0xff] %v435_v27  }
 0x122   :  { %v497_v28 = vpop.f32.mrb[4].mxu0  ;;  %v505_v29 = vpop.f32.mrb[4].mxu1 }
 0x123   :  { %v219_v30 = vpop.f32.mrb[5].mxu0  ;;  %v251_v31 = vpop.f32.mrb[5].mxu1 }
 0x124   :  { %v498_v32 = vpop.f32.mrb[6].mxu0  ;;  %v506_v33 = vpop.f32.mrb[6].mxu1 }
 0x125   :  { %v430_v34 = vpack.c.bf16 %v498_v32, %v497_v28  ;;  %v450_v35 = vpack.c.bf16 %v506_v33, %v505_v29  ;;  %v222_v36 = vpop.f32.mrb[7].mxu0  ;;  %v254_v37 = vpop.f32.mrb[7].mxu1 }
 0x126   :  { %v425_v38 = vpack.c.bf16 %v222_v36, %v219_v30  ;;  %v445_v39 = vpack.c.bf16 %v254_v37, %v251_v31 }
 0x127   :  { %454 = vst [vmem:[#allocation7 + $0x18] sm:$0xff] %v430_v34   ;;  %458 = vst [vmem:[#allocation7 + $0x38] sm:$0xff] %v450_v35  }
 0x128   :  { %453 = vst [vmem:[#allocation7 + $0x10] sm:$0xff] %v425_v38   ;;  %457 = vst [vmem:[#allocation7 + $0x30] sm:$0xff] %v445_v39  }
 0x129   :  { %599 = shalt.err (!%p596_p6)
}
 0x12a   :  { %s600_s10 = scalar_lea.hbm %s683_s2, 1024 }
 0x12b   :  { %p601_p7 = scmp.ne.s32.totalorder %s683_s2, %s600_s10  ;;  %p604_p8 = scmp.lt.u32.totalorder %s600_s10, %s683_s2 }
 0x12d   :  { %p606_p9 = pnand %p604_p8, %p601_p7 }
 0x12f   :  { %609 = shalt.err (!%p606_p9)
}
 0x130   :  { %357 = dma.vmem_to_hbm [thread:$0]  %s352_s6, 1024, %s683_s2, [#allocation4], %s617_s19, %s617_s19, %s618_s20  }
 0x131   :  { %614 = dma.done.wait [#allocation4], 1024  }
 0x132   :  { %615 = vsyncadd [#allocation4], 4294966272 }
 0x133   :  { %361 = vsyncpa [#allocation3], 1 }
 0x134   :  { %362 = vsyncpa [#allocation6], 1 }
 0x135   :  { %363 = vsyncpa [#allocation4], 1 }

</bundles_post_ra>
